<compile_context>
chip_gen: v5e
topology: v5e:2x2
jax: 0.10.0
libtpu: 0.0.40
codegen_flags: <defaults>
</compile_context>

<pallas_src>
import jax
import jax.numpy as jnp
from jax import lax
from jax.experimental import pallas as pl
from jax.experimental.pallas import tpu as pltpu

EPS = 0.001
LANE = 128     # vreg lane width
SUB = 8        # f32 sublane packing; partial-sum accumulator shape is (SUB, LANE)
GROUP = 32     # rows per inner-loop strip (multiple of every sublane packing)


def _cdiv(a, b):
    return -(-a // b)


def _round_up(x, m):
    return _cdiv(x, m) * m


def _sublane_align(dtype):
    # minimum second-minor block alignment for packed dtypes
    return {4: 8, 2: 16, 1: 32}[jnp.dtype(dtype).itemsize]


def _make_kernel(n_inputs, rows_tile, n_chunks, tail_rows, need_mask):
    """Build a kernel for one (sample, chunk) grid step.

    Inputs : n_inputs refs of block (1, rows_tile, LANE)  (preds, trues[, weight])
    Outputs: 2 refs of block (1, 1, SUB, LANE) holding per-chunk partial sums of
             p*t and p+t (per sublane/lane; reduced to scalars in the epilogue).
    """
    n_full = rows_tile // GROUP
    rem = rows_tile - n_full * GROUP          # multiple of the sublane packing

    def fold(x):  # (g, LANE) f32 -> (SUB, LANE); vreg-grouping reshape, VPU adds only
        return x.reshape(-1, SUB, LANE).sum(axis=0)

    def kernel(*refs):
        in_refs = refs[:n_inputs]
        inter_ref = refs[n_inputs]
        sum_ref = refs[n_inputs + 1]
        d = pl.program_id(1)
        if need_mask:
            # valid rows inside this block (only the last chunk is ragged)
            valid = jnp.where(d == n_chunks - 1, tail_rows, rows_tile)

        def strip(row0, n_rows):
            p = in_refs[0][0, pl.ds(row0, n_rows), :].astype(jnp.float32)
            t = in_refs[1][0, pl.ds(row0, n_rows), :].astype(jnp.float32)
            if n_inputs == 3:
                w = in_refs[2][0, pl.ds(row0, n_rows), :].astype(jnp.float32)
                p = p * w
                t = t * w
            if need_mask:
                ridx = lax.broadcasted_iota(jnp.int32, (n_rows, LANE), 0) + row0
                m = ridx < valid
                p = jnp.where(m, p, 0.0)   # select zeroes any OOB garbage (incl. NaN)
                t = jnp.where(m, t, 0.0)
            return p, t

        zeros = jnp.zeros((SUB, LANE), jnp.float32)
        acc_i, acc_s = zeros, zeros

        if n_full > 0:
            def body(g, carry):
                ai, asum = carry
                row0 = pl.multiple_of(g * GROUP, GROUP)
                p, t = strip(row0, GROUP)
                return ai + fold(p * t), asum + fold(p + t)

            acc_i, acc_s = lax.fori_loop(0, n_full, body, (acc_i, acc_s), unroll=2)

        if rem > 0:  # static remainder strip (rows_tile not a multiple of GROUP)
            p, t = strip(n_full * GROUP, rem)
            acc_i = acc_i + fold(p * t)
            acc_s = acc_s + fold(p + t)

        inter_ref[...] = acc_i.reshape(1, 1, SUB, LANE)
        sum_ref[...] = acc_s.reshape(1, 1, SUB, LANE)

    return kernel


def jaccard_loss(preds, trues, weight=None, size_average=True, max_rows_tile=8192):
    """Pallas equivalent of JaccardLoss(weight, size_average).forward(preds, trues).

    `weight`, when given, must be viewable as (num, -1) and broadcastable against
    the flattened inputs — same requirement as the PyTorch code.  It multiplies
    both preds and trues (so the intersection effectively sees w**2), exactly as
    in the reference implementation.
    """
    num = preds.shape[0]
    p = preds.reshape(num, -1)
    t = trues.reshape(num, -1)
    D = p.shape[1]
    inputs = [p, t]
    if weight is not None:
        w = jnp.broadcast_to(jnp.asarray(weight).reshape(num, -1), (num, D))
        inputs.append(w)

    # Stream 1/2/4-byte dtypes natively (cast per-strip in-kernel); anything
    # exotic (bool, f64, ...) is cast to f32 once in the wrapper.
    def canon(x):
        if x.dtype == jnp.bool_ or jnp.dtype(x.dtype).itemsize not in (1, 2, 4):
            return x.astype(jnp.float32)
        return x

    inputs = [canon(x) for x in inputs]
    sub_align = max(_sublane_align(x.dtype) for x in inputs)

    # Balanced chunking: decide #chunks first, then the (aligned) tile size.
    max_rows_tile = _round_up(max(int(max_rows_tile), GROUP), GROUP)
    lanes_ok = (D % LANE == 0)
    rows = _cdiv(D, LANE)
    n_chunks = _cdiv(rows, max_rows_tile)
    rows_tile = _round_up(_cdiv(rows, n_chunks), sub_align)
    rows_padded = rows_tile * n_chunks

    if lanes_ok and rows_padded == rows:
        # exact fit: no pad, no mask
        pad_cols, need_mask, tail_rows, arr_rows = 0, False, rows_tile, rows
    elif lanes_ok and n_chunks > 1:
        # no wrapper pad; mask the ragged last chunk in-kernel
        pad_cols, need_mask, arr_rows = 0, True, rows
        tail_rows = rows - (n_chunks - 1) * rows_tile      # in [1, rows_tile)
    else:
        # lane tail (D % 128 != 0) or a single undersized chunk: pad with zeros
        # (zeros are neutral for sum(p*t) and sum(p+t))
        pad_cols, need_mask, tail_rows, arr_rows = rows_padded * LANE - D, False, rows_tile, rows_padded

    def prep(x):
        if pad_cols:
            x = jnp.pad(x, ((0, 0), (0, pad_cols)))
        return x.reshape(num, arr_rows, LANE)

    arrs = [prep(x) for x in inputs]

    kernel = _make_kernel(len(arrs), rows_tile, n_chunks, tail_rows, need_mask)
    in_specs = [pl.BlockSpec((1, rows_tile, LANE), lambda n, d: (n, d, 0)) for _ in arrs]
    out_spec = pl.BlockSpec((1, 1, SUB, LANE), lambda n, d: (n, d, 0, 0))
    out_shape = (jax.ShapeDtypeStruct((num, n_chunks, SUB, LANE), jnp.float32),) * 2

    # VMEM budget: double-buffered input blocks + headroom; capped at 64 MiB so
    # it is safe on v7x (64 MiB physical) while overriding v5e's 16 MiB default.
    block_bytes = sum(rows_tile * LANE * jnp.dtype(x.dtype).itemsize for x in arrs)
    vmem_limit = int(min(64 << 20, max(32 << 20, 2 * block_bytes + (8 << 20))))

    in_bytes = sum(x.size * jnp.dtype(x.dtype).itemsize for x in arrs)
    out_bytes = 2 * num * n_chunks * SUB * LANE * 4
    flops = (6 if len(arrs) == 3 else 4) * num * arr_rows * LANE

    inter_p, sum_p = pl.pallas_call(
        kernel,
        out_shape=out_shape,
        grid_spec=pltpu.PrefetchScalarGridSpec(
            num_scalar_prefetch=0,
            grid=(num, n_chunks),
            in_specs=in_specs,
            out_specs=[out_spec, out_spec],
        ),
        compiler_params=pltpu.CompilerParams(
            dimension_semantics=("parallel", "parallel"),
            vmem_limit_bytes=vmem_limit,
        ),
        cost_estimate=pl.CostEstimate(
            flops=int(flops),
            transcendentals=0,
            bytes_accessed=int(in_bytes + out_bytes),
        ),
    )(*arrs)

    # Tiny epilogue (per-sample reduce of (n_chunks, 8, 128) partials) in JAX.
    inter = jnp.sum(inter_p, axis=(1, 2, 3))
    tot = jnp.sum(sum_p, axis=(1, 2, 3))
    scores = (inter + EPS) / (tot - inter + EPS)
    score = jnp.sum(scores)
    if size_average:
        score = score / num
    return jnp.clip(score, 0.0, 1.0)


def _jaccard_ref(preds, trues, weight=None, size_average=True):
    """Pure-JAX reference mirroring the PyTorch code."""
    num = preds.shape[0]
    p = preds.reshape(num, -1).astype(jnp.float32)
    t = trues.reshape(num, -1).astype(jnp.float32)
    if weight is not None:
        w = jnp.asarray(weight).reshape(num, -1).astype(jnp.float32)
        p = p * w
        t = t * w
    inter = jnp.sum(p * t, axis=1)
    scores = (inter + EPS) / (jnp.sum(p + t, axis=1) - inter + EPS)
    score = jnp.sum(scores)
    if size_average:
        score = score / num
    return jnp.clip(score, 0.0, 1.0)


if __name__ == "__main__":
    key = jax.random.PRNGKey(0)
    k1, k2, k3, k4, k5 = jax.random.split(key, 5)

    N, C, H, W = 2, 4, 16, 16  # NCHW, as in PyTorch
    preds = jax.nn.sigmoid(jax.random.normal(k1, (N, C, H, W), dtype=jnp.float32))
    trues = (jax.random.uniform(k2, (N, C, H, W)) > 0.5).astype(jnp.float32)

    # 1) Default JaccardLoss path (weight=None), D multiple of 128, exact fit.
    out = jax.block_until_ready(jaccard_loss(preds, trues, weight=None, size_average=True))
    ref = _jaccard_ref(preds, trues, weight=None, size_average=True)
    assert jnp.allclose(out, ref, rtol=1e-5, atol=1e-6), (out, ref)

    # 2) Weighted path (weight multiply fused into the kernel).
    weight = jax.random.uniform(k3, (N, C, H, W), dtype=jnp.float32)
    out_w = jax.block_until_ready(jaccard_loss(preds, trues, weight=weight, size_average=True))
    ref_w = _jaccard_ref(preds, trues, weight=weight, size_average=True)
    assert jnp.allclose(out_w, ref_w, rtol=1e-5, atol=1e-6), (out_w, ref_w)

    # 3) Ragged-last-chunk path: D % 128 == 0 but rows % rows_tile != 0
    #    (no wrapper pad; in-kernel row masking). Small max_rows_tile forces it.
    p3 = jax.nn.sigmoid(jax.random.normal(k4, (2, 4, 32, 40), dtype=jnp.float32))
    t3 = (jax.random.uniform(k5, (2, 4, 32, 40)) > 0.5).astype(jnp.float32)
    out3 = jax.block_until_ready(jaccard_loss(p3, t3, weight=None, size_average=True,
                                              max_rows_tile=32))
    ref3 = _jaccard_ref(p3, t3, weight=None, size_average=True)
    assert jnp.allclose(out3, ref3, rtol=1e-5, atol=1e-6), (out3, ref3)

    # 4) Lane-tail path: D not a multiple of 128 (wrapper zero-pad).
    p4 = p3[..., :15]
    t4 = t3[..., :15]
    out4 = jax.block_until_ready(jaccard_loss(p4, t4, weight=None, size_average=False))
    ref4 = _jaccard_ref(p4, t4, weight=None, size_average=False)
    assert jnp.allclose(out4, ref4, rtol=1e-5, atol=1e-6), (out4, ref4)

    print("KERNEL_OK")
</pallas_src>

<mosaic_0001>
module attributes {stable_mosaic.version = 11 : i64} {
  func.func @kernel(%arg0: i32, %arg1: i32, %arg2: memref<1x8x128xf32, #tpu.memory_space<vmem>>, %arg3: memref<1x8x128xf32, #tpu.memory_space<vmem>>, %arg4: memref<1x1x8x128xf32, #tpu.memory_space<vmem>>, %arg5: memref<1x1x8x128xf32, #tpu.memory_space<vmem>>) attributes {dimension_semantics = [#tpu.dimension_semantics<parallel>, #tpu.dimension_semantics<parallel>], iteration_bounds = array<i64: 2, 1>, scalar_prefetch = 0 : i64, scratch_operands = 0 : i64, tpu.core_type = #tpu.core_type<tc>, window_params = [{transform_indices = @transform_0, window_bounds = array<i64: 1, 8, 128>}, {transform_indices = @transform_1, window_bounds = array<i64: 1, 8, 128>}, {transform_indices = @transform_2, window_bounds = array<i64: 1, 1, 8, 128>}, {transform_indices = @transform_3, window_bounds = array<i64: 1, 1, 8, 128>}]} {
    %cst = arith.constant 0.000000e+00 : f32
    %0 = vector.broadcast %cst : f32 to vector<8x128xf32>
    %c0 = arith.constant 0 : index
    %c0_0 = arith.constant 0 : index
    %c0_1 = arith.constant 0 : index
    %1 = vector.load %arg2[%c0, %c0_0, %c0_1] : memref<1x8x128xf32, #tpu.memory_space<vmem>>, vector<1x8x128xf32>
    %2 = vector.shape_cast %1 : vector<1x8x128xf32> to vector<8x128xf32>
    %c0_2 = arith.constant 0 : index
    %c0_3 = arith.constant 0 : index
    %c0_4 = arith.constant 0 : index
    %3 = vector.load %arg3[%c0_2, %c0_3, %c0_4] : memref<1x8x128xf32, #tpu.memory_space<vmem>>, vector<1x8x128xf32>
    %4 = vector.shape_cast %3 : vector<1x8x128xf32> to vector<8x128xf32>
    %5 = arith.mulf %2, %4 : vector<8x128xf32>
    %6 = vector.shape_cast %5 : vector<8x128xf32> to vector<1x8x128xf32>
    %cst_5 = arith.constant dense<0.000000e+00> : vector<8x128xf32>
    %7 = vector.multi_reduction <add>, %6, %cst_5 [0] : vector<1x8x128xf32> to vector<8x128xf32>
    %8 = arith.addf %0, %7 : vector<8x128xf32>
    %9 = arith.addf %2, %4 : vector<8x128xf32>
    %10 = vector.shape_cast %9 : vector<8x128xf32> to vector<1x8x128xf32>
    %cst_6 = arith.constant dense<0.000000e+00> : vector<8x128xf32>
    %11 = vector.multi_reduction <add>, %10, %cst_6 [0] : vector<1x8x128xf32> to vector<8x128xf32>
    %12 = arith.addf %0, %11 : vector<8x128xf32>
    %13 = vector.shape_cast %8 : vector<8x128xf32> to vector<1x1x8x128xf32>
    %c0_7 = arith.constant 0 : index
    %c0_8 = arith.constant 0 : index
    %c0_9 = arith.constant 0 : index
    %c0_10 = arith.constant 0 : index
    %14 = vector.load %arg4[%c0_7, %c0_8, %c0_9, %c0_10] : memref<1x1x8x128xf32, #tpu.memory_space<vmem>>, vector<1x1x8x128xf32>
    tpu.vector_store %arg4[%c0_7, %c0_8, %c0_9, %c0_10], %13 {strides = array<i32>} : memref<1x1x8x128xf32, #tpu.memory_space<vmem>>, vector<1x1x8x128xf32>,
    %15 = vector.shape_cast %12 : vector<8x128xf32> to vector<1x1x8x128xf32>
    %c0_11 = arith.constant 0 : index
    %c0_12 = arith.constant 0 : index
    %c0_13 = arith.constant 0 : index
    %c0_14 = arith.constant 0 : index
    %16 = vector.load %arg5[%c0_11, %c0_12, %c0_13, %c0_14] : memref<1x1x8x128xf32, #tpu.memory_space<vmem>>, vector<1x1x8x128xf32>
    tpu.vector_store %arg5[%c0_11, %c0_12, %c0_13, %c0_14], %15 {strides = array<i32>} : memref<1x1x8x128xf32, #tpu.memory_space<vmem>>, vector<1x1x8x128xf32>,
    return
  }
  func.func @transform_0(%arg0: i32, %arg1: i32) -> (i32, i32, i32) {
    %c0_i32 = arith.constant 0 : i32
    %c0_i32_0 = arith.constant 0 : i32
    return %arg0, %arg1, %c0_i32 : i32, i32, i32
  }
  func.func @transform_1(%arg0: i32, %arg1: i32) -> (i32, i32, i32) {
    %c0_i32 = arith.constant 0 : i32
    %c0_i32_0 = arith.constant 0 : i32
    return %arg0, %arg1, %c0_i32 : i32, i32, i32
  }
  func.func @transform_2(%arg0: i32, %arg1: i32) -> (i32, i32, i32, i32) {
    %c0_i32 = arith.constant 0 : i32
    %c0_i32_0 = arith.constant 0 : i32
    %c0_i32_1 = arith.constant 0 : i32
    return %arg0, %arg1, %c0_i32, %c0_i32_0 : i32, i32, i32, i32
  }
  func.func @transform_3(%arg0: i32, %arg1: i32) -> (i32, i32, i32, i32) {
    %c0_i32 = arith.constant 0 : i32
    %c0_i32_0 = arith.constant 0 : i32
    %c0_i32_1 = arith.constant 0 : i32
    return %arg0, %arg1, %c0_i32, %c0_i32_0 : i32, i32, i32, i32
  }
}

</mosaic_0001>

<bundles_post_ra>
// kernel: tpu_custom_call.1
= control target key start
LH: loop header
LB: loop body
LE: loop exit
PB: predicated region body
PF: predicated region fallthrough
CT: control target
= control target key end

     0   :  { %9 = vsyncpa [#allocation3], 0  ;;  %s890_s0 = inlined_call_operand.hbm [shape: f32[2,8,128], index: 0, kind: input, shape index: {}]   ;;  %s891_s1 = inlined_call_operand.hbm [shape: f32[2,8,128], index: 1, kind: input, shape index: {}]   ;;  %s892_s2 = inlined_call_operand.hbm [shape: f32[2,1,8,128], index: 2, kind: output, shape index: {0}]   ;;  %s893_s3 = inlined_call_operand.hbm [shape: f32[2,1,8,128], index: 3, kind: output, shape index: {1}]  }
   0x1   :  { %11 = vsyncpa [#allocation3 + $0x1], 0 }
   0x2   :  { %12 = vsyncpa [#allocation6], 0 }
   0x3   :  { %14 = vsyncpa [#allocation6 + $0x1], 0 }
   0x4   :  { %15 = vsyncpa [#allocation4], 0 }
   0x5   :  { %17 = vsyncpa [#allocation4 + $0x1], 0 }
   0x6   :  { %18 = vsyncpa [#allocation9], 0 }
   0x7   :  { %20 = vsyncpa [#allocation9 + $0x1], 0  ;;  %s736_s12 = smov 0   ;;  %s738_s13 = smov 0  }
   0x8   :  { %s740_s14 = smov 0   ;;  %s742_s15 = smov 0  }
   0x9   :  { %s744_s16 = smov 0   ;;  %s746_s17 = smov 0  }
   0xa LB: > { %s445_s18 = sadd.s32 4294967295, %s714_s17   ;;  %s446_s19 = sadd.s32 4294967294, %s714_s17   ;;  %s714_s17 = sphi %s746_s17, %s26_s17   ;;  %s710_s16 = sphi %s744_s16, %s902_s16   ;;  %s706_s15 = sphi %s742_s15, %s901_s15   ;;  %s702_s14 = sphi %s740_s14, %s900_s14   ;;  %s698_s13 = sphi %s738_s13, %s899_s13   ;;  %s694_s12 = sphi %s736_s12, %s898_s12  }
   0xb   : > { %s38_s20 = sadd.s32 1, %s710_s16  ;;  %s47_s21 = sadd.s32 1, %s702_s14 }
   0xc   : > { %p40_p0 = scmp.ge.s32.totalorder %s38_s20, 2  ;;  %p54_p1 = scmp.ne.s32.totalorder %s702_s14, %s698_s13 }
   0xd   : > { %p55_p2 = scmp.eq.s32.totalorder %s714_s17, 0  ;;  %p60_p3 = scmp.ne.s32.totalorder %s698_s13, %s694_s12 }
   0xe   : > { %s904_s20 = smov (%p40_p0, %s38_s20), 0  ;;  %p61_p5 = scmp.eq.s32.totalorder %s445_s18, 0 }
   0xf   : > { %p777_p4 = por %p55_p2, %p54_p1  ;;  %s42_s23 = ssub.s32 %s710_s16, %s904_s20 }
  0x10   : > { %p114_p6 = scmp.eq.s32.totalorder %s445_s18, 1  ;;  %p45_p7 = scmp.eq.s32.totalorder %s42_s23, 0 }
  0x11   : > { %p783_p8 = por %p61_p5, %p60_p3  ;;  %p120_p10 = scmp.eq.s32.totalorder %s446_s19, 1 }
  0x12   : > { %p787_p9 = por %p114_p6, %p54_p1  ;;  %p448_p12 = scmp.ge.s32.totalorder %s714_s17, 2 }
  0x13   : > { %s792_s26 = scalar_select %p45_p7, %s702_s14, %s47_s21  }
  0x14   : > { %p794_p11 = por %p120_p10, %p60_p3  ;;  %p486_p13 = scmp.lt.s32.totalorder %s714_s17, 2 }
  0x15   : > { %s168_s28 = sand.u32 1, %s702_s14   ;;  %s450_s30 = sshll.u32 %s710_s16, 3 }
  0x16   : > { %s449_s29 = sshll.u32 %s168_s28, 3  ;;  %s177_s6 = scalar_lea.hbm %s890_s0, %s450_s30 }
  0x17   : > { %s172_s7 = scalar_lea.vmem [#allocation2], %s449_s29  ;;  %s179_s9 = sshll.u32 %s177_s6, 4  ;;  %s180_s9 = int_to_ptr.hbm [resolvable:$true] %s179_s9 }
  0x18   : > { %s181_s8 = sshll.u32 %s172_s7, 4  ;;  %p473_p0 = pnand %p486_p13, %p777_p4  ;;  %s182_s8 = int_to_ptr.vmem [resolvable:$true] %s181_s8 }
  0x19   : > { %p453_p1 = scmp.ge.s32.totalorder %s714_s17, 1  ;;  %p206_p2 = scmp.lt.s32.totalorder %s714_s17, 3 }
  0x1a   : > { %s169_s10 = scalar_lea.sflag [#allocation3], %s168_s28  ;;  %s197_s19 = scalar_lea.hbm %s891_s1, %s450_s30 }
  0x1b   : > { %475 = dma.hbm_to_vmem [thread:$0]  (!%p473_p0), %s180_s9, 128, %s182_s8, %s169_s10  }
  0x1c   : > { %p207_p3 = pnand %p453_p1, %p206_p2  ;;  %s192_s21 = scalar_lea.vmem [#allocation5], %s449_s29 }
  0x1d   : > { %s201_s23 = sshll.u32 %s192_s21, 4  ;;  %s199_s4 = sshll.u32 %s197_s19, 4  ;;  %s202_s23 = int_to_ptr.vmem [resolvable:$true] %s201_s23  ;;  %s200_s4 = int_to_ptr.hbm [resolvable:$true] %s199_s4 }
  0x1e   : > { %s189_s5 = scalar_lea.sflag [#allocation6], %s168_s28  ;;  %210 = sbr.rel (%p207_p3) target bundleno = 67 (0x43), region = 28 }
  0x1f   : > { %478 = dma.hbm_to_vmem [thread:$0]  (!%p473_p0), %s200_s4, 128, %s202_s23, %s189_s5  }
  0x20   : > { %s813_s22 = sand.u32 (!%p207_p3), 1, %s698_s13  }
  0x21   : > { %s454_s6 = sshll.u32 (!%p207_p3), %s813_s22, 3  ;;  %s213_s7 = scalar_lea.sflag (!%p207_p3), [#allocation3], %s813_s22 }
  0x22   : > { %s216_s8 = scalar_lea.vmem (!%p207_p3), [#allocation2], %s454_s6 }
  0x23   : > { %677 = dma.done.wait (%p783_p8), %s213_s7, 128  }
  0x24   : > { %679 = vsyncadd (%p783_p8), %s213_s7, 4294967168  ;;  %s223_s29 = scalar_lea.sflag [#allocation6], %s813_s22  ;;  %s226_s28 = scalar_lea.vmem [#allocation5], %s454_s6 }
  0x25   : > { %681 = dma.done.wait (%p783_p8), %s223_s29, 128  }
  0x26   : > { %683 = vsyncadd (%p783_p8), %s223_s29, 4294967168  ;;  %s252_s30 = scalar_lea.vmem [#allocation7], %s454_s6  ;;  %s460_s10 = sshll.u32 %s706_s15, 3  ;;  %v260_v0 = vld [vmem:[%s216_s8] sm:$0xff]  ;;  %v261_v1 = vld [vmem:[%s226_s28] sm:$0xff] }
  0x27   : > { %s826_s9 = sshll.u32 %s252_s30, 4  ;;  %s259_s11 = scalar_lea.vmem [#allocation8], %s454_s6  ;;  %v262_v2 = vmul.f32 %v261_v1, %v260_v0  ;;  %v265_v3 = vadd.f32 %v261_v1, %v260_v0  ;;  %s290_s9 = int_to_ptr.vmem [resolvable:$true] %s826_s9 }
  0x28   : > { %s829_s18 = sshll.u32 %s259_s11, 4  ;;  %s287_s23 = scalar_lea.hbm %s892_s2, %s460_s10  ;;  %s305_s18 = int_to_ptr.vmem [resolvable:$true] %s829_s18 }
  0x29   : > { %s291_s4 = sshll.u32 %s287_s23, 4  ;;  %s302_s24 = scalar_lea.hbm %s893_s3, %s460_s10  ;;  %268 = vst [vmem:[%s252_s30] sm:$0xff] %v262_v2  ;;  %s292_s4 = int_to_ptr.hbm [resolvable:$true] %s291_s4 }
  0x2a   : > { %s306_s29 = sshll.u32 %s302_s24, 4  ;;  %269 = vst [vmem:[%s259_s11] sm:$0xff] %v265_v3  ;;  %s271_s15 = scalar_lea.sflag [#allocation4], %s813_s22  ;;  %s839_s29 = int_to_ptr.hbm [resolvable:$true] %s306_s29 }
  0x2b   : > { %s610_s6 = sshra.s32 %s292_s4, 4  ;;  %s616_s28 = scalar_lea.hbm %s892_s2, 16  ;;  %s611_s6 = int_to_ptr.hbm [resolvable:$true] %s610_s6 }
  0x2c   : > { %s612_s19 = scalar_lea.hbm %s611_s6, 8  ;;  %p617_p7 = scmp.lt.s32.totalorder %s611_s6, %s892_s2 }
  0x2d   : > { %p613_p4 = scmp.ne.s32.totalorder %s611_s6, %s612_s19  ;;  %p618_p8 = scmp.lt.s32.totalorder %s616_s28, %s612_s19 }
  0x2f   : > { %p614_p5 = pnand %p613_p4, %p787_p9  ;;  %p619_p10 = por %p618_p8, %p617_p7 }
  0x31   : > { %p615_p6 = pneg %p614_p5 }
  0x33   : > { %p620_p13 = pnand %p619_p10, %p615_p6 }
  0x35   : > { %623 = shalt.err (!%p620_p13)
}
  0x36   : > { %468 = dma.vmem_to_hbm [thread:$0]  (%p787_p9), %s290_s9, 128, %s292_s4, %s271_s15  }
  0x37   : > { %s276_s30 = scalar_lea.sflag [#allocation9], %s813_s22  ;;  %s638_s11 = sshra.s32 %s839_s29, 4  ;;  %s639_s11 = int_to_ptr.hbm [resolvable:$true] %s638_s11 }
  0x38   : > { %s640_s5 = scalar_lea.hbm %s639_s11, 8  ;;  %s644_s6 = scalar_lea.hbm %s893_s3, 16 }
  0x39   : > { %p641_p0 = scmp.ne.s32.totalorder %s639_s11, %s640_s5  ;;  %p645_p3 = scmp.lt.s32.totalorder %s639_s11, %s893_s3 }
  0x3a   : > { %p646_p4 = scmp.lt.s32.totalorder %s644_s6, %s640_s5 }
  0x3b   : > { %p642_p1 = pnand %p641_p0, %p787_p9 }
  0x3c   : > { %p647_p5 = por %p646_p4, %p645_p3 }
  0x3d   : > { %p643_p2 = pneg %p642_p1 }
  0x3f   : > { %p648_p6 = pnand %p647_p5, %p643_p2 }
  0x41   : > { %651 = shalt.err (!%p648_p6)
}
  0x42   : > { %469 = dma.vmem_to_hbm [thread:$0]  (%p787_p9), %s305_s18, 128, %s839_s29, %s276_s30  }
  0x43 PF: > { %s318_s22 = sand.u32 1, %s694_s12   ;;  %p480_p7 = pnand %p448_p12, %p794_p11 }
  0x44   : > { %s319_s9 = scalar_lea.sflag [#allocation4], %s318_s22 }
  0x45   : > { %p481_p8 = pneg %p480_p7 }
  0x47   : > { %685 = dma.done.wait (%p481_p8), %s319_s9, 128  }
  0x48   : > { %687 = vsyncadd (%p481_p8), %s319_s9, 4294967168  ;;  %s329_s4 = scalar_lea.sflag [#allocation9], %s318_s22 }
  0x49   : > { %689 = dma.done.wait (%p481_p8), %s329_s4, 128  }
  0x4a   : > { %691 = vsyncadd (%p481_p8), %s329_s4, 4294967168  ;;  %s26_s17 = sadd.s32 1, %s714_s17   ;;  %s898_s12 = smov %s698_s13 }
  0x4b   : > { %p23_p10 = scmp.ge.s32.totalorder %s26_s17, 4   ;;  %s899_s13 = smov %s702_s14 }
  0x4c   : > { %s900_s14 = smov %s792_s26  ;;  %s901_s15 = smov %s710_s16 }
  0x4d   : > { %s902_s16 = smov %s904_s20  ;;  %25 = sbr.rel (!%p23_p10) target bundleno = 10 (0xa), region = 103 }
  0x52   :  { %335 = vsyncpa [#allocation3], 1 }
  0x53   :  { %337 = vsyncpa [#allocation3 + $0x1], 1 }
  0x54   :  { %338 = vsyncpa [#allocation6], 1 }
  0x55   :  { %340 = vsyncpa [#allocation6 + $0x1], 1 }
  0x56   :  { %341 = vsyncpa [#allocation4], 1 }
  0x57   :  { %343 = vsyncpa [#allocation4 + $0x1], 1 }
  0x58   :  { %344 = vsyncpa [#allocation9], 1 }
  0x59   :  { %346 = vsyncpa [#allocation9 + $0x1], 1 }

</bundles_post_ra>
